<compile_context>
chip_gen: v6e
topology: v6e:2x2x1
jax: 0.10.0
libtpu: 0.0.40
codegen_flags: <defaults>
</compile_context>

<pallas_src>
import functools

import jax
import jax.numpy as jnp
import numpy as np
from jax.experimental import pallas as pl
from jax.experimental.pallas import tpu as pltpu


def make_ring_template(ring_type: str, size: int) -> jnp.ndarray:
    """Matches torch.linspace(0, 2*pi, size) + triangle/sin ring creation."""
    t = jnp.linspace(0.0, 2.0 * np.pi, size)
    if ring_type == "triangle":
        frac = t / (2.0 * np.pi)
        return (2.0 * jnp.abs(2.0 * (frac - jnp.floor(frac + 0.5))) - 1.0).astype(jnp.float32)
    elif ring_type == "sin":
        return jnp.sin(t).astype(jnp.float32)
    else:
        raise ValueError(f"Unknown ring type: {ring_type}")


def ring_linear_kernel(x_ref, pos_ref, bpos_ref, ring_ref, o_ref,
                       w_ref, bias_ref, *, ring_size, neg_inv_2sigma2):
    """One (O-tile, B-tile) grid step.

    x_ref:    (TB, I)  f32     pos_ref:  (I, TO) f32 (positions^T tile)
    bpos_ref: (1, TO)  f32     ring_ref: (R,)    f32 in SMEM
    o_ref:    (TB, TO) f32
    w_ref:    (I, TO)  bf16 VMEM scratch (cached across batch tiles)
    bias_ref: (1, TO)  f32  VMEM scratch (cached across batch tiles)
    """
    R = ring_size

    @pl.when(pl.program_id(1) == 0)  # batch axis is innermost: interpolate once per O tile
    def _():
        # Single pass over the (small, static) ring axis with num/den accumulators.
        # Invariant making the missing max-subtraction safe: logits <= 0 always,
        # and with positions in [0,1) / sigma >= 0.5 the nearest ring slot term
        # is >= exp(-0.5), so `den` cannot underflow.
        rp = pos_ref[...] * float(R)                    # (I, TO)
        brp = bpos_ref[...] * float(R)                  # (1, TO)
        num = jnp.zeros_like(rp)
        den = jnp.zeros_like(rp)
        bnum = jnp.zeros_like(brp)
        bden = jnp.zeros_like(brp)
        for r in range(R):                              # fully unrolled (R is small, e.g. 8)
            t_r = ring_ref[r]                           # scalar read from SMEM
            d = jnp.abs(rp - float(r))
            cd = jnp.minimum(d, float(R) - d)           # circular distance
            e = jnp.exp(neg_inv_2sigma2 * cd * cd)      # EUP exp; logits via mul-only
            num = num + e * t_r
            den = den + e
            bd = jnp.abs(brp - float(r))
            bcd = jnp.minimum(bd, float(R) - bd)
            be = jnp.exp(neg_inv_2sigma2 * bcd * bcd)
            bnum = bnum + be * t_r
            bden = bden + be
        w_ref[...] = (num * pl.reciprocal(den, approx=True)).astype(w_ref.dtype)
        bias_ref[...] = bnum * pl.reciprocal(bden, approx=True)

    # (TB, I) @ (I, TO) on the MXU in bf16 with f32 accumulation.
    y = jnp.dot(x_ref[...].astype(jnp.bfloat16), w_ref[...],
                preferred_element_type=jnp.float32)
    o_ref[...] = (y + bias_ref[...]).astype(o_ref.dtype)


def ring_linear(x, positions, bias_positions, ring_template, ring_size,
                *, block_b=256, block_o=256):
    """y = x @ W(positions)^T + b(bias_positions) with ring-interpolated weights."""
    # TODO(synk): bias=False variant (skip bias interpolation/add) not implemented.
    B, I = x.shape
    O, I2 = positions.shape
    assert I2 == I
    R = int(ring_size)
    sigma = max(0.5, R / 32.0)
    neg_inv_2sigma2 = -0.5 / (sigma * sigma)

    # Tile sizes: full dims for small (toy) shapes, MXU-friendly 256 tiles otherwise.
    TB = B if B <= block_b else block_b     # sublane axis of x/out (mult of 8 when tiled)
    TO = O if O <= block_o else block_o     # lane axis of W/out    (mult of 128 when tiled)
    Bp = pl.cdiv(B, TB) * TB
    Op = pl.cdiv(O, TO) * TO

    xf = x.astype(jnp.float32)
    if Bp != B:
        xf = jnp.pad(xf, ((0, Bp - B), (0, 0)))
    pos_t = positions.astype(jnp.float32).T                      # (I, O): W produced in MXU layout
    bias2d = bias_positions.astype(jnp.float32).reshape(1, O)
    if Op != O:
        pos_t = jnp.pad(pos_t, ((0, 0), (0, Op - O)))
        bias2d = jnp.pad(bias2d, ((0, 0), (0, Op - O)))
    ring = ring_template.astype(jnp.float32).reshape(R)

    grid = (Op // TO, Bp // TB)                                  # batch innermost -> W cached per O tile

    kernel = functools.partial(
        ring_linear_kernel, ring_size=R, neg_inv_2sigma2=float(neg_inv_2sigma2))

    # Rough VMEM budget; only raise the scoped limit when the default could be tight.
    vmem_est = (2 * (TB * I + I * TO + TO + TB * TO) * 4         # double-buffered I/O tiles (f32)
                + I * TO * 2 + TO * 4                            # W (bf16) + bias (f32) scratch
                + 4 * I * TO * 4)                                # interpolation temporaries (f32)
    cp_kwargs = dict(dimension_semantics=("parallel", "arbitrary"))
    if vmem_est > 16 * 1024 * 1024:
        # TODO(synk): re-derive tile sizes per generation (v5e/v6e: 128 MiB VMEM, v7x: 64 MiB).
        cp_kwargs["vmem_limit_bytes"] = min(max(int(vmem_est * 5 // 4), 32 * 1024 * 1024),
                                            96 * 1024 * 1024)

    out = pl.pallas_call(
        kernel,
        out_shape=jax.ShapeDtypeStruct((Bp, Op), jnp.float32),
        grid=grid,
        in_specs=[
            pl.BlockSpec((TB, I), lambda o, b: (b, 0)),          # x
            pl.BlockSpec((I, TO), lambda o, b: (0, o)),          # positions^T
            pl.BlockSpec((1, TO), lambda o, b: (0, o)),          # bias positions
            pl.BlockSpec(memory_space=pltpu.MemorySpace.SMEM),   # ring template (scalar reads)
        ],
        out_specs=pl.BlockSpec((TB, TO), lambda o, b: (b, o)),
        scratch_shapes=[
            pltpu.VMEM((I, TO), jnp.bfloat16),                   # cached W tile
            pltpu.VMEM((1, TO), jnp.float32),                    # cached bias tile
        ],
        compiler_params=pltpu.CompilerParams(**cp_kwargs),
        cost_estimate=pl.CostEstimate(
            flops=2 * Bp * Op * I,
            transcendentals=(I * Op + Op) * R,
            bytes_accessed=4 * (Bp * I + I * Op + Bp * Op + Op)),
    )(xf, pos_t, bias2d, ring)

    return out[:B, :O]


def ring_linear_reference(x, positions, bias_positions, ring_template, ring_size):
    """Pure-JAX reference mirroring the PyTorch forward."""
    sigma = max(0.5, ring_size / 32.0)
    idx = jnp.arange(ring_size, dtype=jnp.float32)

    def interp(p):
        rp = p * ring_size
        d = jnp.abs(rp[..., None] - idx)
        cd = jnp.minimum(d, ring_size - d)
        w = jax.nn.softmax(-0.5 * (cd / sigma) ** 2, axis=-1)
        return w @ ring_template

    W = interp(positions)                    # (O, I)
    b = interp(bias_positions)               # (O,)
    return x @ W.T + b


if __name__ == "__main__":
    in_features = 32
    out_features = 16
    batch = 2
    ring_size = 8
    ring_type = "triangle"

    key = jax.random.PRNGKey(0)
    k_pos, k_bias, k_x = jax.random.split(key, 3)

    positions = jax.random.uniform(k_pos, (out_features, in_features), dtype=jnp.float32)
    bias_positions = jax.random.uniform(k_bias, (out_features,), dtype=jnp.float32)
    ring_template = make_ring_template(ring_type, ring_size)
    x = jax.random.normal(k_x, (batch, in_features), dtype=jnp.float32)

    out = ring_linear(x, positions, bias_positions, ring_template, ring_size)
    out = jax.block_until_ready(out)

    ref = ring_linear_reference(x, positions, bias_positions, ring_template, ring_size)
    # Tolerance covers the bf16 MXU path + approximate reciprocal (f32 accumulation kept).
    np.testing.assert_allclose(np.asarray(out), np.asarray(ref), rtol=5e-2, atol=5e-2)

    print("KERNEL_OK")
</pallas_src>

<mosaic_0001>
module attributes {stable_mosaic.version = 11 : i64} {
  func.func @ring_linear_kernel(%arg0: i32, %arg1: i32, %arg2: memref<2x32xf32, #tpu.memory_space<vmem>>, %arg3: memref<32x16xf32, #tpu.memory_space<vmem>>, %arg4: memref<1x16xf32, #tpu.memory_space<vmem>>, %arg5: memref<8xf32, #tpu.memory_space<smem>>, %arg6: memref<2x16xf32, #tpu.memory_space<vmem>>, %arg7: memref<32x16xbf16, #tpu.memory_space<vmem>>, %arg8: memref<1x16xf32, #tpu.memory_space<vmem>>) attributes {dimension_semantics = [#tpu.dimension_semantics<parallel>, #tpu.dimension_semantics<arbitrary>], iteration_bounds = array<i64: 1, 1>, scalar_prefetch = 0 : i64, scratch_operands = 2 : i64, tpu.core_type = #tpu.core_type<tc>, window_params = [{transform_indices = @transform_0, window_bounds = array<i64: 2, 32>}, {transform_indices = @transform_1, window_bounds = array<i64: 32, 16>}, {transform_indices = @transform_2, window_bounds = array<i64: 1, 16>}, {transform_indices = @transform_3, window_bounds = array<i64: 8>}, {transform_indices = @transform_4, window_bounds = array<i64: 2, 16>}]} {
    %c0_i32 = arith.constant 0 : i32
    %0 = arith.cmpi eq, %arg1, %c0_i32 : i32
    %1 = arith.extui %0 : i1 to i32
    %c0_i32_0 = arith.constant 0 : i32
    %2 = arith.cmpi ne, %1, %c0_i32_0 : i32
    scf.if %2 {
      %c0_8 = arith.constant 0 : index
      %c0_9 = arith.constant 0 : index
      %11 = vector.load %arg3[%c0_8, %c0_9] : memref<32x16xf32, #tpu.memory_space<vmem>>, vector<32x16xf32>
      %cst_10 = arith.constant 8.000000e+00 : f32
      %12 = vector.broadcast %cst_10 : f32 to vector<32x16xf32>
      %13 = arith.mulf %11, %12 : vector<32x16xf32>
      %c0_11 = arith.constant 0 : index
      %c0_12 = arith.constant 0 : index
      %14 = vector.load %arg4[%c0_11, %c0_12] : memref<1x16xf32, #tpu.memory_space<vmem>>, vector<1x16xf32>
      %cst_13 = arith.constant 8.000000e+00 : f32
      %15 = vector.broadcast %cst_13 : f32 to vector<1x16xf32>
      %16 = arith.mulf %14, %15 : vector<1x16xf32>
      %cst_14 = arith.constant 0.000000e+00 : f32
      %17 = vector.broadcast %cst_14 : f32 to vector<32x16xf32>
      %cst_15 = arith.constant 0.000000e+00 : f32
      %18 = vector.broadcast %cst_15 : f32 to vector<32x16xf32>
      %cst_16 = arith.constant 0.000000e+00 : f32
      %19 = vector.broadcast %cst_16 : f32 to vector<1x16xf32>
      %cst_17 = arith.constant 0.000000e+00 : f32
      %20 = vector.broadcast %cst_17 : f32 to vector<1x16xf32>
      %c0_18 = arith.constant 0 : index
      %21 = memref.load %arg5[%c0_18] : memref<8xf32, #tpu.memory_space<smem>>
      %cst_19 = arith.constant 0.000000e+00 : f32
      %22 = vector.broadcast %cst_19 : f32 to vector<32x16xf32>
      %23 = arith.subf %13, %22 : vector<32x16xf32>
      %24 = math.absf %23 : vector<32x16xf32>
      %cst_20 = arith.constant 8.000000e+00 : f32
      %25 = vector.broadcast %cst_20 : f32 to vector<32x16xf32>
      %26 = arith.subf %25, %24 : vector<32x16xf32>
      %27 = arith.minimumf %24, %26 : vector<32x16xf32>
      %cst_21 = arith.constant -2.000000e+00 : f32
      %28 = vector.broadcast %cst_21 : f32 to vector<32x16xf32>
      %29 = arith.mulf %28, %27 : vector<32x16xf32>
      %30 = arith.mulf %29, %27 : vector<32x16xf32>
      %31 = math.exp %30 : vector<32x16xf32>
      %32 = vector.broadcast %21 : f32 to vector<32x16xf32>
      %33 = arith.mulf %31, %32 : vector<32x16xf32>
      %34 = arith.addf %17, %33 : vector<32x16xf32>
      %35 = arith.addf %18, %31 : vector<32x16xf32>
      %cst_22 = arith.constant 0.000000e+00 : f32
      %36 = vector.broadcast %cst_22 : f32 to vector<1x16xf32>
      %37 = arith.subf %16, %36 : vector<1x16xf32>
      %38 = math.absf %37 : vector<1x16xf32>
      %cst_23 = arith.constant 8.000000e+00 : f32
      %39 = vector.broadcast %cst_23 : f32 to vector<1x16xf32>
      %40 = arith.subf %39, %38 : vector<1x16xf32>
      %41 = arith.minimumf %38, %40 : vector<1x16xf32>
      %cst_24 = arith.constant -2.000000e+00 : f32
      %42 = vector.broadcast %cst_24 : f32 to vector<1x16xf32>
      %43 = arith.mulf %42, %41 : vector<1x16xf32>
      %44 = arith.mulf %43, %41 : vector<1x16xf32>
      %45 = math.exp %44 : vector<1x16xf32>
      %46 = vector.broadcast %21 : f32 to vector<1x16xf32>
      %47 = arith.mulf %45, %46 : vector<1x16xf32>
      %48 = arith.addf %19, %47 : vector<1x16xf32>
      %49 = arith.addf %20, %45 : vector<1x16xf32>
      %c1 = arith.constant 1 : index
      %50 = memref.load %arg5[%c1] : memref<8xf32, #tpu.memory_space<smem>>
      %cst_25 = arith.constant 1.000000e+00 : f32
      %51 = vector.broadcast %cst_25 : f32 to vector<32x16xf32>
      %52 = arith.subf %13, %51 : vector<32x16xf32>
      %53 = math.absf %52 : vector<32x16xf32>
      %cst_26 = arith.constant 8.000000e+00 : f32
      %54 = vector.broadcast %cst_26 : f32 to vector<32x16xf32>
      %55 = arith.subf %54, %53 : vector<32x16xf32>
      %56 = arith.minimumf %53, %55 : vector<32x16xf32>
      %cst_27 = arith.constant -2.000000e+00 : f32
      %57 = vector.broadcast %cst_27 : f32 to vector<32x16xf32>
      %58 = arith.mulf %57, %56 : vector<32x16xf32>
      %59 = arith.mulf %58, %56 : vector<32x16xf32>
      %60 = math.exp %59 : vector<32x16xf32>
      %61 = vector.broadcast %50 : f32 to vector<32x16xf32>
      %62 = arith.mulf %60, %61 : vector<32x16xf32>
      %63 = arith.addf %34, %62 : vector<32x16xf32>
      %64 = arith.addf %35, %60 : vector<32x16xf32>
      %cst_28 = arith.constant 1.000000e+00 : f32
      %65 = vector.broadcast %cst_28 : f32 to vector<1x16xf32>
      %66 = arith.subf %16, %65 : vector<1x16xf32>
      %67 = math.absf %66 : vector<1x16xf32>
      %cst_29 = arith.constant 8.000000e+00 : f32
      %68 = vector.broadcast %cst_29 : f32 to vector<1x16xf32>
      %69 = arith.subf %68, %67 : vector<1x16xf32>
      %70 = arith.minimumf %67, %69 : vector<1x16xf32>
      %cst_30 = arith.constant -2.000000e+00 : f32
      %71 = vector.broadcast %cst_30 : f32 to vector<1x16xf32>
      %72 = arith.mulf %71, %70 : vector<1x16xf32>
      %73 = arith.mulf %72, %70 : vector<1x16xf32>
      %74 = math.exp %73 : vector<1x16xf32>
      %75 = vector.broadcast %50 : f32 to vector<1x16xf32>
      %76 = arith.mulf %74, %75 : vector<1x16xf32>
      %77 = arith.addf %48, %76 : vector<1x16xf32>
      %78 = arith.addf %49, %74 : vector<1x16xf32>
      %c2 = arith.constant 2 : index
      %79 = memref.load %arg5[%c2] : memref<8xf32, #tpu.memory_space<smem>>
      %cst_31 = arith.constant 2.000000e+00 : f32
      %80 = vector.broadcast %cst_31 : f32 to vector<32x16xf32>
      %81 = arith.subf %13, %80 : vector<32x16xf32>
      %82 = math.absf %81 : vector<32x16xf32>
      %cst_32 = arith.constant 8.000000e+00 : f32
      %83 = vector.broadcast %cst_32 : f32 to vector<32x16xf32>
      %84 = arith.subf %83, %82 : vector<32x16xf32>
      %85 = arith.minimumf %82, %84 : vector<32x16xf32>
      %cst_33 = arith.constant -2.000000e+00 : f32
      %86 = vector.broadcast %cst_33 : f32 to vector<32x16xf32>
      %87 = arith.mulf %86, %85 : vector<32x16xf32>
      %88 = arith.mulf %87, %85 : vector<32x16xf32>
      %89 = math.exp %88 : vector<32x16xf32>
      %90 = vector.broadcast %79 : f32 to vector<32x16xf32>
      %91 = arith.mulf %89, %90 : vector<32x16xf32>
      %92 = arith.addf %63, %91 : vector<32x16xf32>
      %93 = arith.addf %64, %89 : vector<32x16xf32>
      %cst_34 = arith.constant 2.000000e+00 : f32
      %94 = vector.broadcast %cst_34 : f32 to vector<1x16xf32>
      %95 = arith.subf %16, %94 : vector<1x16xf32>
      %96 = math.absf %95 : vector<1x16xf32>
      %cst_35 = arith.constant 8.000000e+00 : f32
      %97 = vector.broadcast %cst_35 : f32 to vector<1x16xf32>
      %98 = arith.subf %97, %96 : vector<1x16xf32>
      %99 = arith.minimumf %96, %98 : vector<1x16xf32>
      %cst_36 = arith.constant -2.000000e+00 : f32
      %100 = vector.broadcast %cst_36 : f32 to vector<1x16xf32>
      %101 = arith.mulf %100, %99 : vector<1x16xf32>
      %102 = arith.mulf %101, %99 : vector<1x16xf32>
      %103 = math.exp %102 : vector<1x16xf32>
      %104 = vector.broadcast %79 : f32 to vector<1x16xf32>
      %105 = arith.mulf %103, %104 : vector<1x16xf32>
      %106 = arith.addf %77, %105 : vector<1x16xf32>
      %107 = arith.addf %78, %103 : vector<1x16xf32>
      %c3 = arith.constant 3 : index
      %108 = memref.load %arg5[%c3] : memref<8xf32, #tpu.memory_space<smem>>
      %cst_37 = arith.constant 3.000000e+00 : f32
      %109 = vector.broadcast %cst_37 : f32 to vector<32x16xf32>
      %110 = arith.subf %13, %109 : vector<32x16xf32>
      %111 = math.absf %110 : vector<32x16xf32>
      %cst_38 = arith.constant 8.000000e+00 : f32
      %112 = vector.broadcast %cst_38 : f32 to vector<32x16xf32>
      %113 = arith.subf %112, %111 : vector<32x16xf32>
      %114 = arith.minimumf %111, %113 : vector<32x16xf32>
      %cst_39 = arith.constant -2.000000e+00 : f32
      %115 = vector.broadcast %cst_39 : f32 to vector<32x16xf32>
      %116 = arith.mulf %115, %114 : vector<32x16xf32>
      %117 = arith.mulf %116, %114 : vector<32x16xf32>
      %118 = math.exp %117 : vector<32x16xf32>
      %119 = vector.broadcast %108 : f32 to vector<32x16xf32>
      %120 = arith.mulf %118, %119 : vector<32x16xf32>
      %121 = arith.addf %92, %120 : vector<32x16xf32>
      %122 = arith.addf %93, %118 : vector<32x16xf32>
      %cst_40 = arith.constant 3.000000e+00 : f32
      %123 = vector.broadcast %cst_40 : f32 to vector<1x16xf32>
      %124 = arith.subf %16, %123 : vector<1x16xf32>
      %125 = math.absf %124 : vector<1x16xf32>
      %cst_41 = arith.constant 8.000000e+00 : f32
      %126 = vector.broadcast %cst_41 : f32 to vector<1x16xf32>
      %127 = arith.subf %126, %125 : vector<1x16xf32>
      %128 = arith.minimumf %125, %127 : vector<1x16xf32>
      %cst_42 = arith.constant -2.000000e+00 : f32
      %129 = vector.broadcast %cst_42 : f32 to vector<1x16xf32>
      %130 = arith.mulf %129, %128 : vector<1x16xf32>
      %131 = arith.mulf %130, %128 : vector<1x16xf32>
      %132 = math.exp %131 : vector<1x16xf32>
      %133 = vector.broadcast %108 : f32 to vector<1x16xf32>
      %134 = arith.mulf %132, %133 : vector<1x16xf32>
      %135 = arith.addf %106, %134 : vector<1x16xf32>
      %136 = arith.addf %107, %132 : vector<1x16xf32>
      %c4 = arith.constant 4 : index
      %137 = memref.load %arg5[%c4] : memref<8xf32, #tpu.memory_space<smem>>
      %cst_43 = arith.constant 4.000000e+00 : f32
      %138 = vector.broadcast %cst_43 : f32 to vector<32x16xf32>
      %139 = arith.subf %13, %138 : vector<32x16xf32>
      %140 = math.absf %139 : vector<32x16xf32>
      %cst_44 = arith.constant 8.000000e+00 : f32
      %141 = vector.broadcast %cst_44 : f32 to vector<32x16xf32>
      %142 = arith.subf %141, %140 : vector<32x16xf32>
      %143 = arith.minimumf %140, %142 : vector<32x16xf32>
      %cst_45 = arith.constant -2.000000e+00 : f32
      %144 = vector.broadcast %cst_45 : f32 to vector<32x16xf32>
      %145 = arith.mulf %144, %143 : vector<32x16xf32>
      %146 = arith.mulf %145, %143 : vector<32x16xf32>
      %147 = math.exp %146 : vector<32x16xf32>
      %148 = vector.broadcast %137 : f32 to vector<32x16xf32>
      %149 = arith.mulf %147, %148 : vector<32x16xf32>
      %150 = arith.addf %121, %149 : vector<32x16xf32>
      %151 = arith.addf %122, %147 : vector<32x16xf32>
      %cst_46 = arith.constant 4.000000e+00 : f32
      %152 = vector.broadcast %cst_46 : f32 to vector<1x16xf32>
      %153 = arith.subf %16, %152 : vector<1x16xf32>
      %154 = math.absf %153 : vector<1x16xf32>
      %cst_47 = arith.constant 8.000000e+00 : f32
      %155 = vector.broadcast %cst_47 : f32 to vector<1x16xf32>
      %156 = arith.subf %155, %154 : vector<1x16xf32>
      %157 = arith.minimumf %154, %156 : vector<1x16xf32>
      %cst_48 = arith.constant -2.000000e+00 : f32
      %158 = vector.broadcast %cst_48 : f32 to vector<1x16xf32>
      %159 = arith.mulf %158, %157 : vector<1x16xf32>
      %160 = arith.mulf %159, %157 : vector<1x16xf32>
      %161 = math.exp %160 : vector<1x16xf32>
      %162 = vector.broadcast %137 : f32 to vector<1x16xf32>
      %163 = arith.mulf %161, %162 : vector<1x16xf32>
      %164 = arith.addf %135, %163 : vector<1x16xf32>
      %165 = arith.addf %136, %161 : vector<1x16xf32>
      %c5 = arith.constant 5 : index
      %166 = memref.load %arg5[%c5] : memref<8xf32, #tpu.memory_space<smem>>
      %cst_49 = arith.constant 5.000000e+00 : f32
      %167 = vector.broadcast %cst_49 : f32 to vector<32x16xf32>
      %168 = arith.subf %13, %167 : vector<32x16xf32>
      %169 = math.absf %168 : vector<32x16xf32>
      %cst_50 = arith.constant 8.000000e+00 : f32
      %170 = vector.broadcast %cst_50 : f32 to vector<32x16xf32>
      %171 = arith.subf %170, %169 : vector<32x16xf32>
      %172 = arith.minimumf %169, %171 : vector<32x16xf32>
      %cst_51 = arith.constant -2.000000e+00 : f32
      %173 = vector.broadcast %cst_51 : f32 to vector<32x16xf32>
      %174 = arith.mulf %173, %172 : vector<32x16xf32>
      %175 = arith.mulf %174, %172 : vector<32x16xf32>
      %176 = math.exp %175 : vector<32x16xf32>
      %177 = vector.broadcast %166 : f32 to vector<32x16xf32>
      %178 = arith.mulf %176, %177 : vector<32x16xf32>
      %179 = arith.addf %150, %178 : vector<32x16xf32>
      %180 = arith.addf %151, %176 : vector<32x16xf32>
      %cst_52 = arith.constant 5.000000e+00 : f32
      %181 = vector.broadcast %cst_52 : f32 to vector<1x16xf32>
      %182 = arith.subf %16, %181 : vector<1x16xf32>
      %183 = math.absf %182 : vector<1x16xf32>
      %cst_53 = arith.constant 8.000000e+00 : f32
      %184 = vector.broadcast %cst_53 : f32 to vector<1x16xf32>
      %185 = arith.subf %184, %183 : vector<1x16xf32>
      %186 = arith.minimumf %183, %185 : vector<1x16xf32>
      %cst_54 = arith.constant -2.000000e+00 : f32
      %187 = vector.broadcast %cst_54 : f32 to vector<1x16xf32>
      %188 = arith.mulf %187, %186 : vector<1x16xf32>
      %189 = arith.mulf %188, %186 : vector<1x16xf32>
      %190 = math.exp %189 : vector<1x16xf32>
      %191 = vector.broadcast %166 : f32 to vector<1x16xf32>
      %192 = arith.mulf %190, %191 : vector<1x16xf32>
      %193 = arith.addf %164, %192 : vector<1x16xf32>
      %194 = arith.addf %165, %190 : vector<1x16xf32>
      %c6 = arith.constant 6 : index
      %195 = memref.load %arg5[%c6] : memref<8xf32, #tpu.memory_space<smem>>
      %cst_55 = arith.constant 6.000000e+00 : f32
      %196 = vector.broadcast %cst_55 : f32 to vector<32x16xf32>
      %197 = arith.subf %13, %196 : vector<32x16xf32>
      %198 = math.absf %197 : vector<32x16xf32>
      %cst_56 = arith.constant 8.000000e+00 : f32
      %199 = vector.broadcast %cst_56 : f32 to vector<32x16xf32>
      %200 = arith.subf %199, %198 : vector<32x16xf32>
      %201 = arith.minimumf %198, %200 : vector<32x16xf32>
      %cst_57 = arith.constant -2.000000e+00 : f32
      %202 = vector.broadcast %cst_57 : f32 to vector<32x16xf32>
      %203 = arith.mulf %202, %201 : vector<32x16xf32>
      %204 = arith.mulf %203, %201 : vector<32x16xf32>
      %205 = math.exp %204 : vector<32x16xf32>
      %206 = vector.broadcast %195 : f32 to vector<32x16xf32>
      %207 = arith.mulf %205, %206 : vector<32x16xf32>
      %208 = arith.addf %179, %207 : vector<32x16xf32>
      %209 = arith.addf %180, %205 : vector<32x16xf32>
      %cst_58 = arith.constant 6.000000e+00 : f32
      %210 = vector.broadcast %cst_58 : f32 to vector<1x16xf32>
      %211 = arith.subf %16, %210 : vector<1x16xf32>
      %212 = math.absf %211 : vector<1x16xf32>
      %cst_59 = arith.constant 8.000000e+00 : f32
      %213 = vector.broadcast %cst_59 : f32 to vector<1x16xf32>
      %214 = arith.subf %213, %212 : vector<1x16xf32>
      %215 = arith.minimumf %212, %214 : vector<1x16xf32>
      %cst_60 = arith.constant -2.000000e+00 : f32
      %216 = vector.broadcast %cst_60 : f32 to vector<1x16xf32>
      %217 = arith.mulf %216, %215 : vector<1x16xf32>
      %218 = arith.mulf %217, %215 : vector<1x16xf32>
      %219 = math.exp %218 : vector<1x16xf32>
      %220 = vector.broadcast %195 : f32 to vector<1x16xf32>
      %221 = arith.mulf %219, %220 : vector<1x16xf32>
      %222 = arith.addf %193, %221 : vector<1x16xf32>
      %223 = arith.addf %194, %219 : vector<1x16xf32>
      %c7 = arith.constant 7 : index
      %224 = memref.load %arg5[%c7] : memref<8xf32, #tpu.memory_space<smem>>
      %cst_61 = arith.constant 7.000000e+00 : f32
      %225 = vector.broadcast %cst_61 : f32 to vector<32x16xf32>
      %226 = arith.subf %13, %225 : vector<32x16xf32>
      %227 = math.absf %226 : vector<32x16xf32>
      %cst_62 = arith.constant 8.000000e+00 : f32
      %228 = vector.broadcast %cst_62 : f32 to vector<32x16xf32>
      %229 = arith.subf %228, %227 : vector<32x16xf32>
      %230 = arith.minimumf %227, %229 : vector<32x16xf32>
      %cst_63 = arith.constant -2.000000e+00 : f32
      %231 = vector.broadcast %cst_63 : f32 to vector<32x16xf32>
      %232 = arith.mulf %231, %230 : vector<32x16xf32>
      %233 = arith.mulf %232, %230 : vector<32x16xf32>
      %234 = math.exp %233 : vector<32x16xf32>
      %235 = vector.broadcast %224 : f32 to vector<32x16xf32>
      %236 = arith.mulf %234, %235 : vector<32x16xf32>
      %237 = arith.addf %208, %236 : vector<32x16xf32>
      %238 = arith.addf %209, %234 : vector<32x16xf32>
      %cst_64 = arith.constant 7.000000e+00 : f32
      %239 = vector.broadcast %cst_64 : f32 to vector<1x16xf32>
      %240 = arith.subf %16, %239 : vector<1x16xf32>
      %241 = math.absf %240 : vector<1x16xf32>
      %cst_65 = arith.constant 8.000000e+00 : f32
      %242 = vector.broadcast %cst_65 : f32 to vector<1x16xf32>
      %243 = arith.subf %242, %241 : vector<1x16xf32>
      %244 = arith.minimumf %241, %243 : vector<1x16xf32>
      %cst_66 = arith.constant -2.000000e+00 : f32
      %245 = vector.broadcast %cst_66 : f32 to vector<1x16xf32>
      %246 = arith.mulf %245, %244 : vector<1x16xf32>
      %247 = arith.mulf %246, %244 : vector<1x16xf32>
      %248 = math.exp %247 : vector<1x16xf32>
      %249 = vector.broadcast %224 : f32 to vector<1x16xf32>
      %250 = arith.mulf %248, %249 : vector<1x16xf32>
      %251 = arith.addf %222, %250 : vector<1x16xf32>
      %252 = arith.addf %223, %248 : vector<1x16xf32>
      %253 = tpu.reciprocal %238 {approx = true} : vector<32x16xf32> -> vector<32x16xf32>
      %254 = arith.mulf %237, %253 : vector<32x16xf32>
      %255 = arith.truncf %254 : vector<32x16xf32> to vector<32x16xbf16>
      %c0_67 = arith.constant 0 : index
      %c0_68 = arith.constant 0 : index
      %256 = vector.load %arg7[%c0_67, %c0_68] : memref<32x16xbf16, #tpu.memory_space<vmem>>, vector<32x16xbf16>
      tpu.vector_store %arg7[%c0_67, %c0_68], %255 {strides = array<i32>} : memref<32x16xbf16, #tpu.memory_space<vmem>>, vector<32x16xbf16>,
      %257 = tpu.reciprocal %252 {approx = true} : vector<1x16xf32> -> vector<1x16xf32>
      %258 = arith.mulf %251, %257 : vector<1x16xf32>
      %c0_69 = arith.constant 0 : index
      %c0_70 = arith.constant 0 : index
      %259 = vector.load %arg8[%c0_69, %c0_70] : memref<1x16xf32, #tpu.memory_space<vmem>>, vector<1x16xf32>
      tpu.vector_store %arg8[%c0_69, %c0_70], %258 {strides = array<i32>} : memref<1x16xf32, #tpu.memory_space<vmem>>, vector<1x16xf32>,
    } else {
    }
    %c0 = arith.constant 0 : index
    %c0_1 = arith.constant 0 : index
    %3 = vector.load %arg2[%c0, %c0_1] : memref<2x32xf32, #tpu.memory_space<vmem>>, vector<2x32xf32>
    %4 = arith.truncf %3 : vector<2x32xf32> to vector<2x32xbf16>
    %c0_2 = arith.constant 0 : index
    %c0_3 = arith.constant 0 : index
    %5 = vector.load %arg7[%c0_2, %c0_3] : memref<32x16xbf16, #tpu.memory_space<vmem>>, vector<32x16xbf16>
    %cst = arith.constant dense<0.000000e+00> : vector<2x16xf32>
    %6 = tpu.matmul %4, %5, %cst {dimension_numbers = #tpu.dot_dimension_numbers<[1], [0], [0], [1], [0, 0, 1, 1], [], []>} : vector<2x32xbf16>, vector<32x16xbf16>, vector<2x16xf32> -> vector<2x16xf32>
    %c0_4 = arith.constant 0 : index
    %c0_5 = arith.constant 0 : index
    %7 = vector.load %arg8[%c0_4, %c0_5] : memref<1x16xf32, #tpu.memory_space<vmem>>, vector<1x16xf32>
    %8 = vector.broadcast %7 : vector<1x16xf32> to vector<2x16xf32>
    %9 = arith.addf %6, %8 : vector<2x16xf32>
    %c0_6 = arith.constant 0 : index
    %c0_7 = arith.constant 0 : index
    %10 = vector.load %arg6[%c0_6, %c0_7] : memref<2x16xf32, #tpu.memory_space<vmem>>, vector<2x16xf32>
    tpu.vector_store %arg6[%c0_6, %c0_7], %9 {strides = array<i32>} : memref<2x16xf32, #tpu.memory_space<vmem>>, vector<2x16xf32>,
    return
  }
  func.func @transform_0(%arg0: i32, %arg1: i32) -> (i32, i32) {
    %c0_i32 = arith.constant 0 : i32
    %c0_i32_0 = arith.constant 0 : i32
    return %arg1, %c0_i32 : i32, i32
  }
  func.func @transform_1(%arg0: i32, %arg1: i32) -> (i32, i32) {
    %c0_i32 = arith.constant 0 : i32
    %c0_i32_0 = arith.constant 0 : i32
    return %c0_i32, %arg0 : i32, i32
  }
  func.func @transform_2(%arg0: i32, %arg1: i32) -> (i32, i32) {
    %c0_i32 = arith.constant 0 : i32
    %c0_i32_0 = arith.constant 0 : i32
    return %c0_i32, %arg0 : i32, i32
  }
  func.func @transform_3(%arg0: i32, %arg1: i32) -> i32 {
    %c0_i32 = arith.constant 0 : i32
    %c0_i32_0 = arith.constant 0 : i32
    return %c0_i32 : i32
  }
  func.func @transform_4(%arg0: i32, %arg1: i32) -> (i32, i32) {
    %c0_i32 = arith.constant 0 : i32
    return %arg1, %arg0 : i32, i32
  }
}

</mosaic_0001>

<bundles_post_ra>
// kernel: tpu_custom_call.1
= control target key start
LH: loop header
LB: loop body
LE: loop exit
PB: predicated region body
PF: predicated region fallthrough
CT: control target
= control target key end

     0   :  { %9 = vsyncpa [#allocation6], 0  ;;  %s1003_s0 = inlined_call_operand.vmem [shape: f32[2,32], index: 0, kind: input, shape index: {}]   ;;  %s1004_s1 = inlined_call_operand.vmem [shape: f32[32,16], index: 1, kind: input, shape index: {}]   ;;  %s1005_s2 = inlined_call_operand.vmem [shape: f32[1,16], index: 2, kind: input, shape index: {}]   ;;  %s1006_s3 = inlined_call_operand.vmem [shape: f32[8], index: 3, kind: input, shape index: {}]   ;;  %s1007_s4 = inlined_call_operand.hbm [shape: f32[2,16], index: 4, kind: output, shape index: {}]  }
   0x1   :  { %10 = vsyncpa [#allocation5], 0  ;;  %s23_s17 = sshll.u32 %s1006_s3, 4  ;;  %s24_s17 = int_to_ptr.vmem [resolvable:$true] %s23_s17 }
   0x2   :  { %s777_s18 = scalar_lea.vmem %s24_s17, 16  ;;  %p782_p1 = scmp.lt.s32.totalorder %s24_s17, %s24_s17 }
   0x3   :  { %p778_p0 = scmp.ne.s32.totalorder %s24_s17, %s777_s18  ;;  %p783_p2 = scmp.lt.s32.totalorder %s777_s18, %s777_s18 }
   0x5   :  { %p784_p3 = por %p783_p2, %p782_p1 }
   0x7   :  { %p785_p4 = pnand %p784_p3, %p778_p0 }
   0x9   :  { %788 = shalt.err (!%p785_p4)
}
   0xa   :  { %s813_s19 = smov [#allocation4]  }
   0xb   :  { %26 = dma.vmem_to_smem %s24_s17, 16, %s813_s19, [#allocation6]  }
   0xc   :  { %809 = dma.done.wait [#allocation6], 16  }
   0xd   :  { %810 = vsyncadd [#allocation6], 4294967280 }
   0xe   :  { %30 = sfence }
   0xf   :  { %v38_v0 = vld [vmem:[%s1004_s1 + $0x10] sm:$0xff]  ;;  %v39_v1 = vld [vmem:[%s1004_s1 + $0x18] sm:$0xff]  ;;  %v814_v2 = vmov 0.0   ;;  %v36_v13 = vld [vmem:[%s1004_s1] sm:$0xff]  ;;  %s867_s25 = sld [smem:[#allocation4]]  ;;  %vm521_vm0 = vcmask 125952  }
  0x10   :  { %673 = vmatprep.subr.bf16.mxu0 %v814_v2  ;;  %v852_v3 = vmul.f32 8.0, %v38_v0  ;;  %v854_v4 = vmul.f32 8.0, %v39_v1  ;;  %v869_v27 = vmul.f32 8.0, %v36_v13  ;;  %s871_s26 = sld [smem:[#allocation4 + $0x1]]  ;;  %vm815_vm1 = vmmov 0   ;;  %s816_s11 = smov [#allocation7]  }
  0x11   :  { %s622_s27 = sld [smem:[#allocation4 + $0x2]]  ;;  %677 = vmatprep.mubr.msk.bf16.mxu0 %vm815_vm1, %v814_v2  ;;  %vm555_vm2 = vcmask 261120   ;;  %vm528_vm3 = vcmask 122880   ;;  %vm599_vm4 = vcmask 123904  }
  0x12   :  { %v49_v5 = vand.u32 2147483647, %v852_v3  ;;  %v50_v6 = vand.u32 2147483647, %v854_v4  ;;  %v619_v7 = vadd.f32 -1.0, %v852_v3  ;;  %v620_v8 = vadd.f32 -1.0, %v854_v4 }
  0x13   :  { %v625_v9 = vadd.f32 -2.0, %v852_v3  ;;  %v626_v10 = vadd.f32 -2.0, %v854_v4  ;;  %v631_v11 = vadd.f32 -3.0, %v852_v3  ;;  %v632_v12 = vadd.f32 -3.0, %v854_v4  ;;  %s628_s28 = sld [smem:[#allocation4 + $0x3]] }
  0x14   :  { %v53_v14 = vsub.f32 8.0, %v49_v5  ;;  %v54_v15 = vsub.f32 8.0, %v50_v6  ;;  %v105_v16 = vand.u32 2147483647, %v619_v7  ;;  %v106_v17 = vand.u32 2147483647, %v620_v8 }
  0x15   :  { %v162_v18 = vand.u32 2147483647, %v625_v9  ;;  %v163_v19 = vand.u32 2147483647, %v626_v10  ;;  %v219_v20 = vand.u32 2147483647, %v631_v11  ;;  %v874_v52 = vstv %s867_s25 }
  0x16   :  { %v57_v21 = vmin.f32 %v49_v5, %v53_v14  ;;  %v58_v22 = vmin.f32 %v50_v6, %v54_v15  ;;  %v109_v23 = vsub.f32 8.0, %v105_v16  ;;  %v110_v24 = vsub.f32 8.0, %v106_v17  ;;  %s895_s29 = sld [smem:[#allocation4 + $0x4]] }
  0x17   :  { %v166_v25 = vsub.f32 8.0, %v162_v18  ;;  %v167_v26 = vsub.f32 8.0, %v163_v19  ;;  %v220_v34 = vand.u32 2147483647, %v632_v12  ;;  %v223_v35 = vsub.f32 8.0, %v219_v20  ;;  %s898_s30 = sld [smem:[#allocation4 + $0x5]] }
  0x18   :  { %v61_v28 = vmul.f32 -2.0, %v57_v21  ;;  %v62_v29 = vmul.f32 -2.0, %v58_v22  ;;  %v113_v30 = vmin.f32 %v105_v16, %v109_v23  ;;  %v114_v31 = vmin.f32 %v106_v17, %v110_v24  ;;  %s929_s7 = sld [smem:[#allocation4 + $0x7]] }
  0x19   :  { %v170_v32 = vmin.f32 %v162_v18, %v166_v25  ;;  %v171_v33 = vmin.f32 %v163_v19, %v167_v26  ;;  %v224_v42 = vsub.f32 8.0, %v220_v34  ;;  %v227_v43 = vmin.f32 %v219_v20, %v223_v35 }
  0x1a   :  { %v65_v36 = vmul.f32 %v61_v28, %v57_v21  ;;  %v66_v37 = vmul.f32 %v62_v29, %v58_v22  ;;  %v117_v38 = vmul.f32 -2.0, %v113_v30  ;;  %v118_v39 = vmul.f32 -2.0, %v114_v31 }
  0x1b   :  { %v174_v40 = vmul.f32 -2.0, %v170_v32  ;;  %v175_v41 = vmul.f32 -2.0, %v171_v33  ;;  %v228_v50 = vmin.f32 %v220_v34, %v224_v42  ;;  %v231_v51 = vmul.f32 -2.0, %v227_v43 }
  0x1c   :  { %v71_v44 = vmul.f32 1.442695, %v65_v36  ;;  %v73_v45 = vmul.f32 1.442695, %v66_v37  ;;  %v121_v46 = vmul.f32 %v117_v38, %v113_v30  ;;  %v122_v47 = vmul.f32 %v118_v39, %v114_v31 }
  0x1d   :  { %v178_v48 = vmul.f32 %v174_v40, %v170_v32  ;;  %v179_v49 = vmul.f32 %v175_v41, %v171_v33  ;;  %v232_v57 = vmul.f32 -2.0, %v228_v50  ;;  %v235_v58 = vmul.f32 %v231_v51, %v227_v43 }
  0x1e   :  { %687 = vpow2.f32 %v71_v44  ;;  %v127_v53 = vmul.f32 1.442695, %v121_v46  ;;  %v129_v54 = vmul.f32 1.442695, %v122_v47  ;;  %v637_v59 = vadd.f32 -4.0, %v852_v3 }
  0x1f   :  { %689 = vpow2.f32 %v73_v45  ;;  %v184_v55 = vmul.f32 1.442695, %v178_v48  ;;  %v186_v56 = vmul.f32 1.442695, %v179_v49  ;;  %v638_v60 = vadd.f32 -4.0, %v854_v4 }
  0x20   :  { %691 = vpow2.f32 %v127_v53  ;;  %v879_v61 = vstv %s871_s26  ;;  %v236_v62 = vmul.f32 %v232_v57, %v228_v50  ;;  %v643_v63 = vadd.f32 -5.0, %v852_v3 }
  0x21   :  { %693 = vpow2.f32 %v129_v54  ;;  %v241_v0 = vmul.f32 1.442695, %v235_v58  ;;  %v276_v1 = vand.u32 2147483647, %v637_v59  ;;  %v277_v5 = vand.u32 2147483647, %v638_v60 }
  0x22   :  { %695 = vpow2.f32 %v184_v55  ;;  %v243_v6 = vmul.f32 1.442695, %v236_v62  ;;  %v644_v7 = vadd.f32 -5.0, %v854_v4  ;;  %v333_v8 = vand.u32 2147483647, %v643_v63  ;;  %v37_v54 = vld [vmem:[%s1004_s1 + $0x8] sm:$0xff] }
  0x23   :  { %697 = vpow2.f32 %v186_v56  ;;  %v883_v9 = vstv %s622_s27  ;;  %v280_v10 = vsub.f32 8.0, %v276_v1  ;;  %v281_v11 = vsub.f32 8.0, %v277_v5  ;;  %s922_s1 = sld [smem:[#allocation4 + $0x6]] }
  0x24   :  { %699 = vpow2.f32 %v241_v0  ;;  %v334_v12 = vand.u32 2147483647, %v644_v7  ;;  %v337_v13 = vsub.f32 8.0, %v333_v8  ;;  %v649_v14 = vadd.f32 -6.0, %v852_v3 }
  0x25   :  { %701 = vpow2.f32 %v243_v6  ;;  %v886_v15 = vstv %s628_s28  ;;  %v284_v16 = vmin.f32 %v276_v1, %v280_v10  ;;  %v285_v17 = vmin.f32 %v277_v5, %v281_v11 }
  0x26   :  { %v650_v18 = vadd.f32 -6.0, %v854_v4  ;;  %v338_v19 = vsub.f32 8.0, %v334_v12  ;;  %v341_v20 = vmin.f32 %v333_v8, %v337_v13  ;;  %v390_v21 = vand.u32 2147483647, %v649_v14 }
  0x27   :  { %v890_v22 = vadd.f32 -7.0, %v852_v3  ;;  %v288_v23 = vmul.f32 -2.0, %v284_v16  ;;  %v289_v24 = vmul.f32 -2.0, %v285_v17  ;;  %v893_v26 = vadd.f32 -7.0, %v854_v4 }
  0x28   :  { %v391_v25 = vand.u32 2147483647, %v650_v18  ;;  %v342_v28 = vmin.f32 %v334_v12, %v338_v19  ;;  %v345_v29 = vmul.f32 -2.0, %v341_v20  ;;  %v394_v30 = vsub.f32 8.0, %v390_v21 }
  0x29   :  { %v447_v31 = vand.u32 2147483647, %v890_v22  ;;  %v292_v32 = vmul.f32 %v288_v23, %v284_v16  ;;  %v293_v33 = vmul.f32 %v289_v24, %v285_v17  ;;  %v448_v3 = vand.u32 2147483647, %v893_v26 }
  0x2a   :  { %v395_v34 = vsub.f32 8.0, %v391_v25  ;;  %v346_v36 = vmul.f32 -2.0, %v342_v28  ;;  %v349_v37 = vmul.f32 %v345_v29, %v341_v20  ;;  %v398_v38 = vmin.f32 %v390_v21, %v394_v30 }
  0x2b   :  { %v688_v35 = vpop.eup %687  ;;  %v451_v4 = vsub.f32 8.0, %v447_v31  ;;  %v298_v41 = vmul.f32 1.442695, %v292_v32  ;;  %v300_v42 = vmul.f32 1.442695, %v293_v33  ;;  %v910_v7 = vmul.f32 8.0, %v37_v54 }
  0x2c   :  { %v690_v39 = vpop.eup %689  ;;  %v78_v40 = vmul.f32 %v688_v35, %v874_v52  ;;  %v399_v43 = vmin.f32 %v391_v25, %v395_v34  ;;  %v350_v46 = vmul.f32 %v346_v36, %v342_v28  ;;  %v355_v47 = vmul.f32 1.442695, %v349_v37 }
  0x2d   :  { %v692_v44 = vpop.eup %691  ;;  %v79_v45 = vmul.f32 %v690_v39, %v874_v52  ;;  %v402_v48 = vmul.f32 -2.0, %v398_v38  ;;  %703 = vpow2.f32 %v298_v41  ;;  %v913_v10 = vstv %s895_s29 }
  0x2e   :  { %v694_v49 = vpop.eup %693  ;;  %v134_v50 = vmul.f32 %v692_v44, %v879_v61  ;;  %v142_v51 = vadd.f32 %v692_v44, %v688_v35  ;;  %v403_v53 = vmul.f32 -2.0, %v399_v43  ;;  %705 = vpow2.f32 %v300_v42 }
  0x2f   :  { %v696_v55 = vpop.eup %695  ;;  %v135_v56 = vmul.f32 %v694_v49, %v879_v61  ;;  %v143_v57 = vadd.f32 %v694_v49, %v690_v39  ;;  %v357_v58 = vmul.f32 1.442695, %v350_v46  ;;  %707 = vpow2.f32 %v355_v47 }
  0x30   :  { %v698_v59 = vpop.eup %697  ;;  %v138_v60 = vadd.f32 %v134_v50, %v78_v40  ;;  %v191_v62 = vmul.f32 %v696_v55, %v883_v9  ;;  %v199_v63 = vadd.f32 %v696_v55, %v142_v51  ;;  %v916_v11 = vstv %s898_s30 }
  0x31   :  { %v700_v0 = vpop.eup %699  ;;  %v139_v1 = vadd.f32 %v135_v56, %v79_v45  ;;  %v192_v5 = vmul.f32 %v698_v59, %v883_v9  ;;  %v200_v6 = vadd.f32 %v698_v59, %v143_v57  ;;  %709 = vpow2.f32 %v357_v58 }
  0x32   :  { %v702_v8 = vpop.eup %701  ;;  %v406_v12 = vmul.f32 %v402_v48, %v398_v38  ;;  %v195_v13 = vadd.f32 %v191_v62, %v138_v60  ;;  %v248_v14 = vmul.f32 %v700_v0, %v886_v15  ;;  %v256_v16 = vadd.f32 %v700_v0, %v199_v63 }
  0x33   :  { %v407_v17 = vmul.f32 %v403_v53, %v399_v43  ;;  %v196_v18 = vadd.f32 %v192_v5, %v139_v1  ;;  %v452_v20 = vsub.f32 8.0, %v448_v3  ;;  %v455_v21 = vmin.f32 %v447_v31, %v451_v4 }
  0x34   :  { %v412_v19 = vmul.f32 1.442695, %v406_v12  ;;  %v249_v22 = vmul.f32 %v702_v8, %v886_v15  ;;  %v257_v23 = vadd.f32 %v702_v8, %v200_v6  ;;  %v47_v25 = vand.u32 2147483647, %v869_v27 }
  0x35   :  { %v414_v24 = vmul.f32 1.442695, %v407_v17  ;;  %v456_v26 = vmin.f32 %v448_v3, %v452_v20  ;;  %v459_v28 = vmul.f32 -2.0, %v455_v21  ;;  %v48_v29 = vand.u32 2147483647, %v910_v7 }
  0x36   :  { %711 = vpow2.f32 %v412_v19  ;;  %v51_v30 = vsub.f32 8.0, %v47_v25  ;;  %v617_v32 = vadd.f32 -1.0, %v869_v27  ;;  %v618_v33 = vadd.f32 -1.0, %v910_v7 }
  0x37   :  { %713 = vpow2.f32 %v414_v24  ;;  %v460_v31 = vmul.f32 -2.0, %v456_v26  ;;  %v463_v34 = vmul.f32 %v459_v28, %v455_v21  ;;  %v52_v35 = vsub.f32 8.0, %v48_v29 }
  0x38   :  { %v623_v36 = vadd.f32 -2.0, %v869_v27  ;;  %v55_v37 = vmin.f32 %v47_v25, %v51_v30  ;;  %v103_v38 = vand.u32 2147483647, %v617_v32  ;;  %v104_v4 = vand.u32 2147483647, %v618_v33 }
  0x39   :  { %v624_v3 = vadd.f32 -2.0, %v910_v7  ;;  %v252_v39 = vadd.f32 %v248_v14, %v195_v13  ;;  %v464_v40 = vmul.f32 %v460_v31, %v456_v26  ;;  %v469_v41 = vmul.f32 1.442695, %v463_v34 }
  0x3a   :  { %v56_v42 = vmin.f32 %v48_v29, %v52_v35  ;;  %v704_v43 = vpop.eup %703  ;;  %v253_v44 = vadd.f32 %v249_v22, %v196_v18  ;;  %v59_v45 = vmul.f32 -2.0, %v55_v37  ;;  %v107_v46 = vsub.f32 8.0, %v103_v38 }
  0x3b   :  { %v108_v47 = vsub.f32 8.0, %v104_v4  ;;  %v706_v48 = vpop.eup %705  ;;  %v305_v49 = vmul.f32 %v704_v43, %v913_v10  ;;  %v313_v50 = vadd.f32 %v704_v43, %v256_v16  ;;  %715 = vpow2.f32 %v469_v41 }
  0x3c   :  { %v471_v51 = vmul.f32 1.442695, %v464_v40  ;;  %v708_v53 = vpop.eup %707  ;;  %v306_v54 = vmul.f32 %v706_v48, %v913_v10  ;;  %v60_v55 = vmul.f32 -2.0, %v56_v42  ;;  %v160_v56 = vand.u32 2147483647, %v623_v36 }
  0x3d   :  { %v161_v57 = vand.u32 2147483647, %v624_v3  ;;  %v309_v59 = vadd.f32 %v305_v49, %v252_v39  ;;  %v314_v60 = vadd.f32 %v706_v48, %v257_v23  ;;  %v933_v62 = vstv %s922_s1 }
  0x3e   :  { %717 = vpow2.f32 %v471_v51  ;;  %v710_v58 = vpop.eup %709  ;;  %v63_v63 = vmul.f32 %v59_v45, %v55_v37  ;;  %v362_v0 = vmul.f32 %v708_v53, %v916_v11  ;;  %v370_v1 = vadd.f32 %v708_v53, %v313_v50 }
  0x3f   :  { %v111_v5 = vmin.f32 %v103_v38, %v107_v46  ;;  %v112_v6 = vmin.f32 %v104_v4, %v108_v47  ;;  %v310_v8 = vadd.f32 %v306_v54, %v253_v44  ;;  %v64_v12 = vmul.f32 %v60_v55, %v56_v42 }
  0x40   :  { %v164_v13 = vsub.f32 8.0, %v160_v56  ;;  %v165_v14 = vsub.f32 8.0, %v161_v57  ;;  %v363_v16 = vmul.f32 %v710_v58, %v916_v11  ;;  %v629_v19 = vadd.f32 -3.0, %v869_v27 }
  0x41   :  { %v115_v17 = vmul.f32 -2.0, %v111_v5  ;;  %v116_v18 = vmul.f32 -2.0, %v112_v6  ;;  %v67_v21 = vmul.f32 1.442695, %v63_v63  ;;  %v630_v24 = vadd.f32 -3.0, %v910_v7 }
  0x42   :  { %v168_v22 = vmin.f32 %v160_v56, %v164_v13  ;;  %v169_v23 = vmin.f32 %v161_v57, %v165_v14  ;;  %v371_v26 = vadd.f32 %v710_v58, %v314_v60  ;;  %v940_v28 = vstv %s929_s7 }
  0x43   :  { %v712_v20 = vpop.eup %711  ;;  %v119_v29 = vmul.f32 %v115_v17, %v111_v5  ;;  %v120_v30 = vmul.f32 %v116_v18, %v112_v6  ;;  %v366_v32 = vadd.f32 %v362_v0, %v309_v59  ;;  %v69_v33 = vmul.f32 1.442695, %v64_v12 }
  0x44   :  { %v714_v25 = vpop.eup %713  ;;  %v172_v31 = vmul.f32 -2.0, %v168_v22  ;;  %v173_v34 = vmul.f32 -2.0, %v169_v23  ;;  %v367_v35 = vadd.f32 %v363_v16, %v310_v8  ;;  %v427_v36 = vadd.f32 %v712_v20, %v370_v1 }
  0x45   :  { %v123_v37 = vmul.f32 1.442695, %v119_v29  ;;  %v217_v38 = vand.u32 2147483647, %v629_v19  ;;  %v419_v4 = vmul.f32 %v712_v20, %v933_v62  ;;  %719 = vpow2.f32 %v67_v21 }
  0x46   :  { %v125_v3 = vmul.f32 1.442695, %v120_v30  ;;  %v218_v39 = vand.u32 2147483647, %v630_v24  ;;  %v428_v40 = vadd.f32 %v714_v25, %v371_v26  ;;  %v635_v42 = vadd.f32 -4.0, %v869_v27 }
  0x47   :  { %v221_v41 = vsub.f32 8.0, %v217_v38  ;;  %v636_v43 = vadd.f32 -4.0, %v910_v7  ;;  %721 = vpow2.f32 %v69_v33  ;;  %v176_v45 = vmul.f32 %v172_v31, %v168_v22 }
  0x48   :  { %v716_v44 = vpop.eup %715  ;;  %v177_v46 = vmul.f32 %v173_v34, %v169_v23  ;;  %v222_v47 = vsub.f32 8.0, %v218_v39  ;;  %723 = vpow2.f32 %v123_v37  ;;  %v274_v50 = vand.u32 2147483647, %v635_v42 }
  0x49   :  { %v484_v48 = vadd.f32 %v716_v44, %v427_v36  ;;  %v225_v49 = vmin.f32 %v217_v38, %v221_v41  ;;  %725 = vpow2.f32 %v125_v3  ;;  %v275_v54 = vand.u32 2147483647, %v636_v43 }
  0x4a   :  { %v226_v53 = vmin.f32 %v218_v39, %v222_v47  ;;  %v641_v55 = vadd.f32 -5.0, %v869_v27  ;;  %v420_v56 = vmul.f32 %v714_v25, %v933_v62  ;;  %v423_v57 = vadd.f32 %v419_v4, %v366_v32 }
  0x4b   :  { %v718_v51 = vpop.eup %717  ;;  %727 = vrcp.f32 %v484_v48  ;;  %v180_v59 = vmul.f32 1.442695, %v176_v45  ;;  %v229_v60 = vmul.f32 -2.0, %v225_v49  ;;  %v278_v0 = vsub.f32 8.0, %v274_v50 }
  0x4c   :  { %v485_v58 = vadd.f32 %v718_v51, %v428_v40  ;;  %v230_v63 = vmul.f32 -2.0, %v226_v53  ;;  %v182_v1 = vmul.f32 1.442695, %v177_v46  ;;  %v279_v5 = vsub.f32 8.0, %v275_v54 }
  0x4d   :  { %v642_v6 = vadd.f32 -5.0, %v910_v7  ;;  %v233_v8 = vmul.f32 %v229_v60, %v225_v49  ;;  %v282_v13 = vmin.f32 %v274_v50, %v278_v0  ;;  %v331_v14 = vand.u32 2147483647, %v641_v55 }
  0x4e   :  { %729 = vrcp.f32 %v485_v58  ;;  %v234_v12 = vmul.f32 %v230_v63, %v226_v53  ;;  %v424_v16 = vadd.f32 %v420_v56, %v367_v35  ;;  %v283_v17 = vmin.f32 %v275_v54, %v279_v5 }
  0x4f   :  { %v332_v18 = vand.u32 2147483647, %v642_v6  ;;  %v647_v19 = vadd.f32 -6.0, %v869_v27  ;;  %v476_v20 = vmul.f32 %v716_v44, %v940_v28  ;;  %731 = vpow2.f32 %v180_v59 }
  0x50   :  { %v237_v21 = vmul.f32 1.442695, %v233_v8  ;;  %v286_v22 = vmul.f32 -2.0, %v282_v13  ;;  %v287_v23 = vmul.f32 -2.0, %v283_v17  ;;  %v335_v24 = vsub.f32 8.0, %v331_v14 }
  0x51   :  { %v336_v25 = vsub.f32 8.0, %v332_v18  ;;  %v648_v26 = vadd.f32 -6.0, %v910_v7  ;;  %733 = vpow2.f32 %v182_v1  ;;  %v239_v29 = vmul.f32 1.442695, %v234_v12 }
  0x52   :  { %v290_v30 = vmul.f32 %v286_v22, %v282_v13  ;;  %v388_v32 = vand.u32 2147483647, %v647_v19  ;;  %v720_v33 = vpop.eup %719  ;;  %v477_v31 = vmul.f32 %v718_v51, %v940_v28  ;;  %v291_v34 = vmul.f32 %v287_v23, %v283_v17 }
  0x53   :  { %v339_v35 = vmin.f32 %v331_v14, %v335_v24  ;;  %v340_v36 = vmin.f32 %v332_v18, %v336_v25  ;;  %v389_v38 = vand.u32 2147483647, %v648_v26  ;;  %v480_v3 = vadd.f32 %v476_v20, %v423_v57 }
  0x54   :  { %v294_v37 = vmul.f32 1.442695, %v290_v30  ;;  %v722_v4 = vpop.eup %721  ;;  %735 = vpow2.f32 %v237_v21  ;;  %v392_v40 = vsub.f32 8.0, %v388_v32  ;;  %v296_v42 = vmul.f32 1.442695, %v291_v34 }
  0x55   :  { %v343_v39 = vmul.f32 -2.0, %v339_v35  ;;  %v724_v41 = vpop.eup %723  ;;  %737 = vpow2.f32 %v239_v29  ;;  %v344_v43 = vmul.f32 -2.0, %v340_v36  ;;  %v481_v45 = vadd.f32 %v477_v31, %v424_v16 }
  0x56   :  { %v726_v44 = vpop.eup %725  ;;  %v393_v47 = vsub.f32 8.0, %v389_v38  ;;  %739 = vpow2.f32 %v294_v37  ;;  %v653_v50 = vadd.f32 -7.0, %v869_v27  ;;  %v654_v51 = vadd.f32 -7.0, %v910_v7  ;;  %v44_v7 = vld [vmem:[%s1005_s2] sm:$0x1] }
  0x57   :  { %v347_v46 = vmul.f32 %v343_v39, %v339_v35  ;;  %v348_v49 = vmul.f32 %v344_v43, %v340_v36  ;;  %v396_v55 = vmin.f32 %v388_v32, %v392_v40  ;;  %v76_v58 = vmul.f32 %v720_v33, %v874_v52 }
  0x58   :  { %v728_v48 = vpop.eup %727  ;;  %v397_v56 = vmin.f32 %v389_v38, %v393_v47  ;;  %741 = vpow2.f32 %v296_v42  ;;  %v132_v0 = vmul.f32 %v724_v41, %v879_v61  ;;  %v140_v5 = vadd.f32 %v724_v41, %v720_v33 }
  0x59   :  { %v503_v53 = vmul.f32 %v728_v48, %v480_v3  ;;  %v351_v54 = vmul.f32 1.442695, %v347_v46  ;;  %v353_v59 = vmul.f32 1.442695, %v348_v49  ;;  %v400_v1 = vmul.f32 -2.0, %v396_v55 }
  0x5a   :  { %v401_v27 = vmul.f32 -2.0, %v397_v56  ;;  %v445_v6 = vand.u32 2147483647, %v653_v50  ;;  %v446_v14 = vand.u32 2147483647, %v654_v51  ;;  %v141_v16 = vadd.f32 %v726_v44, %v722_v4 }
  0x5b   :  { %v730_v57 = vpop.eup %729  ;;  %v668_v63 = vpack.c.bf16 %v503_v53, %v503_v53  ;;  %743 = vpow2.f32 %v351_v54  ;;  %v404_v13 = vmul.f32 %v400_v1, %v396_v55  ;;  %v962_v22 = vmul.f32 8.0, %v44_v7 }
  0x5c   :  { %v504_v60 = vmul.f32 %v730_v57, %v481_v45  ;;  %v732_v8 = vpop.eup %731  ;;  %745 = vpow2.f32 %v353_v59  ;;  %v405_v17 = vmul.f32 %v401_v27, %v397_v56  ;;  %v449_v18 = vsub.f32 8.0, %v445_v6 }
  0x5d   :  { %524 = vst.msk [vmem:[#allocation2 + $0x8] sm:$0xf] %vm521_vm0, %v668_v63  ;;  %v408_v20 = vmul.f32 1.442695, %v404_v13  ;;  %v450_v21 = vsub.f32 8.0, %v446_v14  ;;  %v77_v23 = vmul.f32 %v722_v4, %v874_v52  ;;  %v133_v24 = vmul.f32 %v726_v44, %v879_v61 }
  0x5e   :  { %v669_v12 = vpack.c.bf16 %v504_v60, %v504_v60  ;;  %v734_v19 = vpop.eup %733  ;;  %v410_v25 = vmul.f32 1.442695, %v405_v17  ;;  %v453_v26 = vmin.f32 %v445_v6, %v449_v18  ;;  %v136_v29 = vadd.f32 %v132_v0, %v76_v58 }
  0x5f   :  { %v189_v30 = vmul.f32 %v732_v8, %v883_v9  ;;  %v197_v32 = vadd.f32 %v732_v8, %v140_v5  ;;  %v454_v33 = vmin.f32 %v446_v14, %v450_v21  ;;  %v198_v34 = vadd.f32 %v734_v19, %v141_v16 }
  0x60   :  { %525 = vst.msk [vmem:[#allocation2 + $0xc] sm:$0xf] %vm521_vm0, %v669_v12  ;;  %747 = vpow2.f32 %v408_v20  ;;  %v457_v35 = vmul.f32 -2.0, %v453_v26  ;;  %v88_v36 = vand.u32 2147483647, %v962_v22  ;;  %v621_v4 = vadd.f32 -1.0, %v962_v22 }
  0x61   :  { %v736_v31 = vpop.eup %735  ;;  %749 = vpow2.f32 %v410_v25  ;;  %v458_v38 = vmul.f32 -2.0, %v454_v33  ;;  %v627_v3 = vadd.f32 -2.0, %v962_v22  ;;  %v137_v39 = vadd.f32 %v133_v24, %v77_v23 }
  0x62   :  { %v738_v37 = vpop.eup %737  ;;  %v190_v40 = vmul.f32 %v734_v19, %v883_v9  ;;  %v461_v41 = vmul.f32 %v457_v35, %v453_v26  ;;  %v89_v42 = vsub.f32 8.0, %v88_v36  ;;  %v193_v44 = vadd.f32 %v189_v30, %v136_v29 }
  0x63   :  { %v740_v43 = vpop.eup %739  ;;  %v254_v45 = vadd.f32 %v736_v31, %v197_v32  ;;  %v462_v46 = vmul.f32 %v458_v38, %v454_v33  ;;  %v145_v47 = vand.u32 2147483647, %v621_v4  ;;  %v255_v49 = vadd.f32 %v738_v37, %v198_v34 }
  0x64   :  { %v465_v50 = vmul.f32 1.442695, %v461_v41  ;;  %v90_v51 = vmin.f32 %v88_v36, %v89_v42  ;;  %v633_v53 = vadd.f32 -3.0, %v962_v22  ;;  %v246_v55 = vmul.f32 %v736_v31, %v886_v15 }
  0x65   :  { %v742_v54 = vpop.eup %741  ;;  %v467_v56 = vmul.f32 1.442695, %v462_v46  ;;  %v146_v57 = vsub.f32 8.0, %v145_v47  ;;  %v202_v58 = vand.u32 2147483647, %v627_v3  ;;  %v639_v63 = vadd.f32 -4.0, %v962_v22 }
  0x66   :  { %751 = vpow2.f32 %v465_v50  ;;  %v91_v59 = vmul.f32 -2.0, %v90_v51  ;;  %v259_v60 = vand.u32 2147483647, %v633_v53  ;;  %v194_v1 = vadd.f32 %v190_v40, %v137_v39 }
  0x67   :  { %v685_v48 = vld [vmem:[#allocation2 + $0x8] sm:$0xff]   ;;  %v311_v5 = vadd.f32 %v740_v43, %v254_v45  ;;  %753 = vpow2.f32 %v467_v56  ;;  %v147_v27 = vmin.f32 %v145_v47, %v146_v57  ;;  %v247_v6 = vmul.f32 %v738_v37, %v886_v15 }
  0x68   :  { %674 = vmatpush3.bf16.msra.mxu0 %v685_v48  ;;  %v744_v0 = vpop.eup %743  ;;  %v312_v7 = vadd.f32 %v742_v54, %v255_v49  ;;  %v92_v8 = vmul.f32 %v91_v59, %v90_v51  ;;  %v203_v12 = vsub.f32 8.0, %v202_v58  ;;  %v250_v14 = vadd.f32 %v246_v55, %v193_v44 }
  0x69   :  { %675 = vmatprep.subr.bf16.mxu0 %v814_v2  ;;  %v746_v13 = vpop.eup %745  ;;  %v148_v16 = vmul.f32 -2.0, %v147_v27  ;;  %v260_v17 = vsub.f32 8.0, %v259_v60  ;;  %v316_v18 = vand.u32 2147483647, %v639_v63  ;;  %v303_v19 = vmul.f32 %v740_v43, %v913_v10 }
  0x6a   :  { %v93_v20 = vmul.f32 1.442695, %v92_v8  ;;  %v204_v21 = vmin.f32 %v202_v58, %v203_v12  ;;  %v645_v2 = vadd.f32 -5.0, %v962_v22  ;;  %v368_v23 = vadd.f32 %v744_v0, %v311_v5 }
  0x6b   :  { %v149_v24 = vmul.f32 %v148_v16, %v147_v27  ;;  %v261_v25 = vmin.f32 %v259_v60, %v260_v17  ;;  %v317_v26 = vsub.f32 8.0, %v316_v18  ;;  %v369_v29 = vadd.f32 %v746_v13, %v312_v7 }
  0x6c   :  { %v205_v30 = vmul.f32 -2.0, %v204_v21  ;;  %v373_v32 = vand.u32 2147483647, %v645_v2  ;;  %v651_v33 = vadd.f32 -6.0, %v962_v22  ;;  %755 = vpow2.f32 %v93_v20 }
  0x6d   :  { %v748_v31 = vpop.eup %747  ;;  %v150_v34 = vmul.f32 1.442695, %v149_v24  ;;  %v262_v35 = vmul.f32 -2.0, %v261_v25  ;;  %v657_v36 = vadd.f32 -7.0, %v962_v22  ;;  %v251_v38 = vadd.f32 %v247_v6, %v194_v1 }
  0x6e   :  { %v750_v37 = vpop.eup %749  ;;  %v304_v4 = vmul.f32 %v742_v54, %v913_v10  ;;  %v206_v3 = vmul.f32 %v205_v30, %v204_v21  ;;  %v318_v39 = vmin.f32 %v316_v18, %v317_v26  ;;  %v307_v40 = vadd.f32 %v303_v19, %v250_v14 }
  0x6f   :  { %757 = vpow2.f32 %v150_v34  ;;  %v263_v41 = vmul.f32 %v262_v35, %v261_v25  ;;  %v374_v42 = vsub.f32 8.0, %v373_v32  ;;  %v425_v43 = vadd.f32 %v748_v31, %v368_v23 }
  0x70   :  { %v207_v44 = vmul.f32 1.442695, %v206_v3  ;;  %v319_v45 = vmul.f32 -2.0, %v318_v39  ;;  %v430_v46 = vand.u32 2147483647, %v651_v33  ;;  %v426_v47 = vadd.f32 %v750_v37, %v369_v29 }
  0x71   :  { %v264_v48 = vmul.f32 1.442695, %v263_v41  ;;  %v375_v49 = vmin.f32 %v373_v32, %v374_v42  ;;  %v487_v50 = vand.u32 2147483647, %v657_v36  ;;  %v360_v22 = vmul.f32 %v744_v0, %v916_v11 }
  0x72   :  { %759 = vpow2.f32 %v207_v44  ;;  %v320_v51 = vmul.f32 %v319_v45, %v318_v39  ;;  %v431_v53 = vsub.f32 8.0, %v430_v46  ;;  %v308_v55 = vadd.f32 %v304_v4, %v251_v38 }
  0x73   :  { %v752_v54 = vpop.eup %751  ;;  %761 = vpow2.f32 %v264_v48  ;;  %v376_v56 = vmul.f32 -2.0, %v375_v49  ;;  %v488_v57 = vsub.f32 8.0, %v487_v50  ;;  %v361_v59 = vmul.f32 %v746_v13, %v916_v11 }
  0x74   :  { %v754_v58 = vpop.eup %753  ;;  %v482_v60 = vadd.f32 %v752_v54, %v425_v43  ;;  %v321_v63 = vmul.f32 1.442695, %v320_v51  ;;  %v432_v1 = vmin.f32 %v430_v46, %v431_v53  ;;  %v364_v7 = vadd.f32 %v360_v22, %v307_v40 }
  0x75   :  { %v483_v5 = vadd.f32 %v754_v58, %v426_v47  ;;  %v377_v27 = vmul.f32 %v376_v56, %v375_v49  ;;  %v489_v6 = vmin.f32 %v487_v50, %v488_v57  ;;  %v417_v8 = vmul.f32 %v748_v31, %v933_v62 }
  0x76   :  { %763 = vrcp.f32 %v482_v60  ;;  %v433_v0 = vmul.f32 -2.0, %v432_v1  ;;  %v365_v16 = vadd.f32 %v361_v59, %v308_v55  ;;  %v418_v17 = vmul.f32 %v750_v37, %v933_v62 }
  0x77   :  { %765 = vrcp.f32 %v483_v5  ;;  %v378_v12 = vmul.f32 1.442695, %v377_v27  ;;  %v490_v14 = vmul.f32 -2.0, %v489_v6  ;;  %v421_v21 = vadd.f32 %v417_v8, %v364_v7 }
  0x78   :  { %767 = vpow2.f32 %v321_v63  ;;  %v434_v18 = vmul.f32 %v433_v0, %v432_v1  ;;  %v422_v24 = vadd.f32 %v418_v17, %v365_v16  ;;  %v474_v25 = vmul.f32 %v752_v54, %v940_v28  ;;  %v530_v54 = vld [vmem:[%s1003_s0] sm:$0x3]  ;;  %s607_s0 = sshll.u32 %s816_s11, 4  ;;  %s608_s0 = int_to_ptr.vmem [resolvable:$true] %s607_s0 }
  0x79   :  { %769 = vpow2.f32 %v378_v12  ;;  %v491_v13 = vmul.f32 %v490_v14, %v489_v6  ;;  %v756_v19 = vpop.eup %755  ;;  %v475_v29 = vmul.f32 %v754_v58, %v940_v28  ;;  %s789_s12 = scalar_lea.vmem %s608_s0, 32  ;;  %p794_p6 = scmp.lt.s32.totalorder %s608_s0, %s608_s0 }
  0x7a   :  { %v435_v20 = vmul.f32 1.442695, %v434_v18  ;;  %v95_v26 = vmul.f32 %v756_v19, %v874_v52  ;;  %v478_v34 = vadd.f32 %v474_v25, %v421_v21  ;;  %p790_p5 = scmp.ne.s32.totalorder %s608_s0, %s789_s12  ;;  %p795_p7 = scmp.lt.s32.totalorder %s789_s12, %s789_s12 }
  0x7b   :  { %v492_v2 = vmul.f32 1.442695, %v491_v13  ;;  %v479_v38 = vadd.f32 %v475_v29, %v422_v24 }
  0x7c   :  { %v758_v23 = vpop.eup %757  ;;  %771 = vpow2.f32 %v435_v20  ;;  %p796_p8 = por %p795_p7, %p794_p6 }
  0x7d   :  { %v152_v30 = vmul.f32 %v758_v23, %v879_v61  ;;  %v154_v32 = vadd.f32 %v758_v23, %v756_v19  ;;  %773 = vpow2.f32 %v492_v2 }
  0x7e   :  { %p797_p9 = pnand %p796_p8, %p790_p5 }
  0x7f   :  { %v760_v33 = vpop.eup %759  ;;  %v153_v35 = vadd.f32 %v152_v30, %v95_v26 }
  0x80   :  { %v762_v31 = vpop.eup %761  ;;  %v209_v36 = vmul.f32 %v760_v33, %v883_v9  ;;  %v211_v37 = vadd.f32 %v760_v33, %v154_v32 }
  0x81   :  { %v266_v41 = vmul.f32 %v762_v31, %v886_v15 }
  0x82   :  { %v268_v4 = vadd.f32 %v762_v31, %v211_v37  ;;  %v210_v52 = vadd.f32 %v209_v36, %v153_v35 }
  0x83   :  { %v764_v3 = vpop.eup %763 }
  0x84   :  { %v766_v39 = vpop.eup %765  ;;  %v501_v40 = vmul.f32 %v764_v3, %v478_v34  ;;  %v267_v47 = vadd.f32 %v266_v41, %v210_v52 }
  0x85   :  { %v768_v42 = vpop.eup %767  ;;  %v502_v43 = vmul.f32 %v766_v39, %v479_v38 }
  0x86   :  { %v770_v61 = vpop.eup %769  ;;  %v666_v44 = vpack.c.bf16 %v501_v40, %v501_v40  ;;  %v325_v45 = vadd.f32 %v768_v42, %v268_v4  ;;  %v323_v9 = vmul.f32 %v768_v42, %v913_v10  ;;  %v531_v10 = vpack.c.bf16 %v530_v54, %v530_v54 }
  0x87   :  { %v667_v46 = vpack.c.bf16 %v502_v43, %v502_v43  ;;  %v380_v15 = vmul.f32 %v770_v61, %v916_v11 }
  0x88   :  { %522 = vst.msk [vmem:[#allocation2] sm:$0xf] %vm521_vm0, %v666_v44  ;;  %v382_v48 = vadd.f32 %v770_v61, %v325_v45  ;;  %v324_v51 = vadd.f32 %v323_v9, %v267_v47 }
  0x89   :  { %v772_v49 = vpop.eup %771  ;;  %523 = vst.msk [vmem:[#allocation2 + $0x4] sm:$0xf] %vm521_vm0, %v667_v46 }
  0x8a   :  { %v774_v50 = vpop.eup %773  ;;  %v439_v22 = vadd.f32 %v772_v49, %v382_v48  ;;  %v381_v56 = vadd.f32 %v380_v15, %v324_v51  ;;  %v437_v57 = vmul.f32 %v772_v49, %v933_v62 }
  0x8b   :  { %v494_v59 = vmul.f32 %v774_v50, %v940_v28 }
  0x8c   :  { %v496_v53 = vadd.f32 %v774_v50, %v439_v22  ;;  %v438_v58 = vadd.f32 %v437_v57, %v381_v56 }
  0x8e   :  { %775 = vrcp.f32 %v496_v53  ;;  %v495_v60 = vadd.f32 %v494_v59, %v438_v58 }
  0x90   :  { %v686_v55 = vld [vmem:[#allocation2] sm:$0xff]  }
  0x91   :  { %676 = vmatpush3.bf16.msra.mxu0 %v686_v55 }
  0x94   :  { %678 = vmatmul.mubr.msk.bf16.vlgmr.msra.gmra.mxu0 %vm555_vm2, %v531_v10 }
  0x9b   :  { %v776_v63 = vpop.eup %775 }
  0x9c   :  { %v527_v11 = vmul.f32 %v776_v63, %v495_v60 }
  0x9e   :  { %529 = vst.msk [vmem:[#allocation3] sm:$0x1] %vm528_vm3, %v527_v11 }
  0xa5   :  { %v662_v1 = vld [vmem:[#allocation3] ss:$0 sm:$0xff] }
 0x154   :  { %v593_v5 = vpop.f32.mrf.mxu0 }
 0x155   :  { %v594_v27 = vadd.f32 %v662_v1, %v593_v5 }
 0x156   :  { %v679_v62 = vpop.f32.mrf.mxu0 }
 0x157   :  { %600 = vst.msk [vmem:[#allocation7] sm:$0x3] %vm599_vm4, %v594_v27 }
 0x158   :  { %v596_v6 = vpop.f32.mrf.mxu0 }
 0x159   :  { %800 = shalt.err (!%p797_p9)
}
 0x15a   :  { %610 = dma.vmem_to_hbm [thread:$0]  %s608_s0, 32, %s1007_s4, [#allocation5]   ;;  %v680_v28 = vpop.f32.mrf.mxu0 }
 0x15b   :  { %811 = dma.done.wait [#allocation5], 32  }
 0x15c   :  { %812 = vsyncadd [#allocation5], 4294967264 }
 0x15d   :  { %614 = vsyncpa [#allocation5], 1 }
 0x15e   :  { %615 = vsyncpa [#allocation6], 1 }

</bundles_post_ra>
